<compile_context>
chip_gen: v5e
topology: v5e:2x2
jax: 0.10.0
libtpu: 0.0.40
codegen_flags: <defaults>
</compile_context>

<pallas_src>
import functools

import jax
import jax.numpy as jnp
from jax.experimental import pallas as pl
from jax.experimental.pallas import tpu as pltpu


# -----------------------------------------------------------------------------
# Small helpers
# -----------------------------------------------------------------------------
def _pick_tile(n, target):
    """Largest tile <= target that divides n; prefers multiples of 128 (lane/MXU friendly)."""
    if n <= target:
        return n
    start = target - (target % 128) if target >= 128 else target
    for cand in range(start, 0, -128):
        if cand > 0 and n % cand == 0:
            return cand
    return n  # fall back to the whole axis


def _vmem_limit_bytes():
    """Generation-aware scoped-VMEM limit: capacity minus headroom for Mosaic scratch."""
    cap = 64 * 1024 * 1024  # conservative fallback (safe on v7x's 64 MiB per-TC VMEM)
    try:
        info = pltpu.get_tpu_info()
        cap = int(getattr(info, "vmem_capacity_bytes", cap))
    except Exception:
        pass
    return max(cap - 16 * 1024 * 1024, 32 * 1024 * 1024)


def _pick_qkv_col_groups(C, D, num_heads, budget_bytes=8 * 1024 * 1024):
    """# of QKV weight column groups (divisor of H) so the bf16 (C, 3*Cg) tile <= budget."""
    for n in range(1, num_heads + 1):
        if num_heads % n:
            continue
        cg = (num_heads // n) * D
        if C * 3 * cg * 2 <= budget_bytes:
            return n
    return num_heads


def _pick_head_group(num_heads, tq, tkv, budget_bytes=2 * 1024 * 1024):
    """Head-group size (divisor of H) so the (G, tq, tkv) f32 logits temp <= budget."""
    g = num_heads
    while g > 1 and g * tq * tkv * 4 > budget_bytes:
        g -= 1
        while g > 1 and num_heads % g:
            g -= 1
    return max(g, 1)


def _spec(block_shape, index_map, *, single_buffer=False):
    """BlockSpec; constant-index operands get pipeline_mode=Buffered(1) (no wasted 2x VMEM)."""
    if single_buffer:
        try:
            return pl.BlockSpec(block_shape, index_map, pipeline_mode=pl.Buffered(1))
        except Exception:  # older jax without pipeline_mode / Buffered(1)
            pass
    return pl.BlockSpec(block_shape, index_map)


# -----------------------------------------------------------------------------
# Kernel 1: LayerNorm + QKV projection (scale pre-folded), head-major bf16 outputs.
# -----------------------------------------------------------------------------
def _ln_qkv_kernel(x_ref, g_ref, b_ref, w_ref, bqkv_ref, q_ref, k_ref, v_ref, *,
                   heads_per_group, head_dim, eps):
    Cg = heads_per_group * head_dim

    xx = x_ref[...].astype(jnp.float32)                       # (tl, C)
    # One-pass LN statistics (sum and sum-of-squares): halves the XLU reduction passes.
    mean = jnp.mean(xx, axis=-1, keepdims=True)
    meansq = jnp.mean(xx * xx, axis=-1, keepdims=True)
    var = jnp.maximum(meansq - mean * mean, 0.0)
    xn = (xx - mean) * jax.lax.rsqrt(var + eps)               # EUP rsqrt
    xn = xn * g_ref[...] + b_ref[...]

    # bf16 MXU operands, f32 accumulation.  W/b already carry the softmax scale on the
    # q columns (folded in the wrapper), so no per-step VPU multiply here.
    qkv = jnp.dot(xn.astype(jnp.bfloat16), w_ref[...],
                  preferred_element_type=jnp.float32)         # (tl, 3*Cg) f32
    qkv = qkv + bqkv_ref[...]

    # Head-major split via static lane slices (no in-kernel transpose).
    # TODO(synk): for head_dim < 128 these are masked stores; head packing not implemented.
    for hh in range(heads_per_group):
        lo = hh * head_dim
        q_ref[hh] = qkv[:, lo:lo + head_dim].astype(q_ref.dtype)
        k_ref[hh] = qkv[:, Cg + lo:Cg + lo + head_dim].astype(k_ref.dtype)
        v_ref[hh] = qkv[:, 2 * Cg + lo:2 * Cg + lo + head_dim].astype(v_ref.dtype)


# -----------------------------------------------------------------------------
# Kernel 2: flash attention (online softmax, head-grouped) + fused out-proj + residual.
# -----------------------------------------------------------------------------
def _flash_attn_kernel(x_ref, q_ref, k_ref, v_ref, wproj_ref, bproj_ref, o_ref,
                       m_sc, l_sc, acc_sc, *, num_heads, head_group):
    ki = pl.program_id(2)

    @pl.when(ki == 0)
    def _():
        m_sc[...] = jnp.full(m_sc.shape, -jnp.inf, dtype=m_sc.dtype)
        l_sc[...] = jnp.zeros(l_sc.shape, dtype=l_sc.dtype)
        acc_sc[...] = jnp.zeros(acc_sc.shape, dtype=acc_sc.dtype)

    # Head-group loop bounds the (G, tq, tkv) f32 logits / p temporaries (undeclared
    # Mosaic scratch) instead of materializing the full (H, tq, tkv) tensor at once.
    for g0 in range(0, num_heads, head_group):
        g1 = g0 + head_group
        q = q_ref[g0:g1]                                      # (G, tq, D)  bf16, pre-scaled
        k = k_ref[g0:g1]                                      # (G, tkv, D) bf16
        v = v_ref[g0:g1]                                      # (G, tkv, D) bf16

        s = jnp.einsum('hqd,hkd->hqk', q, k,
                       preferred_element_type=jnp.float32)    # (G, tq, tkv) f32

        m_prev = m_sc[g0:g1]
        m_new = jnp.maximum(m_prev, jnp.max(s, axis=-1, keepdims=True))
        alpha = jnp.exp(m_prev - m_new)                       # f32 softmax math (v5e-safe)
        # TODO(synk): bf16 exp on v6e/v7x (EUP throughput) not enabled; keeping f32.
        p = jnp.exp(s - m_new)
        l_sc[g0:g1] = alpha * l_sc[g0:g1] + jnp.sum(p, axis=-1, keepdims=True)
        acc_sc[g0:g1] = alpha * acc_sc[g0:g1] + jnp.einsum(
            'hqk,hkd->hqd', p.astype(v.dtype), v, preferred_element_type=jnp.float32)
        m_sc[g0:g1] = m_new

    @pl.when(ki == pl.num_programs(2) - 1)
    def _():
        inv_l = pl.reciprocal(l_sc[...], approx=True)         # EUP reciprocal (frees VALU)
        ctx = (acc_sc[...] * inv_l).astype(jnp.bfloat16)      # (H, tq, D)
        # One-time head merge (runs once per q tile, not per kv step), then a single
        # K=C contraction that fills the MXU systolic depth.
        ctx2 = jnp.concatenate([ctx[h] for h in range(num_heads)], axis=-1)   # (tq, C)
        y = x_ref[...].astype(jnp.float32) + bproj_ref[...]
        y = y + jnp.dot(ctx2, wproj_ref[...], preferred_element_type=jnp.float32)
        o_ref[...] = y.astype(o_ref.dtype)


# -----------------------------------------------------------------------------
# Wrapper
# -----------------------------------------------------------------------------
def self_attn_skip_layer(x, ln_gamma, ln_beta, w_qkv, b_qkv, w_proj, b_proj, *,
                         num_heads, eps=1e-6, q_tile=256, kv_tile=1024,
                         skip_input=None):
    """Forward of SelfAttnSkipLayer.

    x: (B, L, C) f32; ln_gamma/ln_beta: (C,); w_qkv: (C, 3C) (in_proj weight^T);
    b_qkv: (3C,); w_proj: (C, C) (out_proj weight^T); b_proj: (C,).
    `skip_input` is accepted but (exactly like the PyTorch module) unused.
    """
    del skip_input
    B, L, C = x.shape
    assert C % num_heads == 0
    D = C // num_heads
    scale = float(D) ** -0.5

    tl = _pick_tile(L, q_tile)       # row tile for LN+QKV and for q
    tq = tl
    tkv = _pick_tile(L, kv_tile)

    # v7x has 2 TensorCores: make sure the parallel grid extent of kernel 2 can be >= 2.
    if B * (L // tq) < 2:
        for cand in (tq // 2, tq // 4):
            if cand and cand % 8 == 0 and L % cand == 0:
                tq = cand
                break

    # -------------------- weight prep (one-time XLA ops) ----------------------------
    # Fold the softmax scale into W_q AND b_q (f32) before the bf16 cast.
    wq = w_qkv[:, :C] * scale
    wk = w_qkv[:, C:2 * C]
    wv = w_qkv[:, 2 * C:]
    bq = b_qkv[:C] * scale
    bk = b_qkv[C:2 * C]
    bv = b_qkv[2 * C:]

    # Column-group the QKV weight by heads so the resident weight tile stays bounded.
    n_wg = _pick_qkv_col_groups(C, D, num_heads)
    Hg = num_heads // n_wg
    Cg = Hg * D
    w_groups = jnp.stack(
        [jnp.concatenate([wq[:, g * Cg:(g + 1) * Cg],
                          wk[:, g * Cg:(g + 1) * Cg],
                          wv[:, g * Cg:(g + 1) * Cg]], axis=1)
         for g in range(n_wg)], axis=0).astype(jnp.bfloat16)               # (n_wg, C, 3*Cg)
    b_groups = jnp.stack(
        [jnp.concatenate([bq[g * Cg:(g + 1) * Cg],
                          bk[g * Cg:(g + 1) * Cg],
                          bv[g * Cg:(g + 1) * Cg]], axis=0)
         for g in range(n_wg)], axis=0).reshape(n_wg, 1, 3 * Cg).astype(jnp.float32)

    wproj_bf = w_proj.astype(jnp.bfloat16)                                 # (C, C)
    ln_g2 = ln_gamma.reshape(1, C).astype(jnp.float32)
    ln_b2 = ln_beta.reshape(1, C).astype(jnp.float32)
    bproj2 = b_proj.reshape(1, C).astype(jnp.float32)

    vmem_limit = _vmem_limit_bytes()   # capacity - headroom (48 MiB v7x, ~112 MiB v5e/v6e)
    head_group = _pick_head_group(num_heads, tq, tkv)
    single_w = (n_wg == 1)             # weight index map constant only when not tiled

    # ---- kernel 1: LayerNorm + QKV projection ------------------------------------------
    qkv_cost = pl.CostEstimate(
        flops=2 * B * L * C * 3 * C + 10 * B * L * C,
        transcendentals=B * L * n_wg,
        bytes_accessed=n_wg * 4 * B * L * C + 2 * C * 3 * C + 3 * 2 * B * L * C)

    q, k, v = pl.pallas_call(
        functools.partial(_ln_qkv_kernel, heads_per_group=Hg, head_dim=D, eps=eps),
        out_shape=tuple(jax.ShapeDtypeStruct((B, num_heads, L, D), jnp.bfloat16)
                        for _ in range(3)),
        grid_spec=pltpu.PrefetchScalarGridSpec(
            num_scalar_prefetch=0,
            grid=(B, L // tl, n_wg),
            in_specs=[
                _spec((pl.Squeezed(), tl, C), lambda b, i, g: (b, i, 0)),            # x
                _spec((1, C), lambda b, i, g: (0, 0), single_buffer=True),           # LN gamma
                _spec((1, C), lambda b, i, g: (0, 0), single_buffer=True),           # LN beta
                _spec((pl.Squeezed(), C, 3 * Cg), lambda b, i, g: (g, 0, 0),
                      single_buffer=single_w),                                       # W_qkv grp
                _spec((pl.Squeezed(), 1, 3 * Cg), lambda b, i, g: (g, 0, 0),
                      single_buffer=single_w),                                       # b_qkv grp
            ],
            out_specs=tuple(
                pl.BlockSpec((pl.Squeezed(), Hg, tl, D), lambda b, i, g: (b, g, i, 0))
                for _ in range(3)),
        ),
        compiler_params=pltpu.CompilerParams(
            dimension_semantics=("parallel", "parallel", "arbitrary"),
            vmem_limit_bytes=vmem_limit),
        cost_estimate=qkv_cost,
    )(x, ln_g2, ln_b2, w_groups, b_groups)

    # ---- kernel 2: flash attention + out-proj + bias + residual ------------------------
    attn_cost = pl.CostEstimate(
        flops=4 * B * L * L * C + 2 * B * L * C * C,
        transcendentals=B * num_heads * L * L,
        bytes_accessed=3 * 2 * B * L * C + 4 * B * L * C + 2 * C * C + 4 * B * L * C)

    out = pl.pallas_call(
        functools.partial(_flash_attn_kernel, num_heads=num_heads, head_group=head_group),
        out_shape=jax.ShapeDtypeStruct((B, L, C), x.dtype),
        grid_spec=pltpu.PrefetchScalarGridSpec(
            num_scalar_prefetch=0,
            grid=(B, L // tq, L // tkv),
            in_specs=[
                _spec((pl.Squeezed(), tq, C),
                      lambda b, qi, ki: (b, qi, 0)),                                  # x (residual)
                _spec((pl.Squeezed(), num_heads, tq, D),
                      lambda b, qi, ki: (b, 0, qi, 0)),                               # q
                _spec((pl.Squeezed(), num_heads, tkv, D),
                      lambda b, qi, ki: (b, 0, ki, 0)),                               # k
                _spec((pl.Squeezed(), num_heads, tkv, D),
                      lambda b, qi, ki: (b, 0, ki, 0)),                               # v
                _spec((C, C), lambda b, qi, ki: (0, 0), single_buffer=True),          # W_proj
                _spec((1, C), lambda b, qi, ki: (0, 0), single_buffer=True),          # b_proj
            ],
            out_specs=pl.BlockSpec((pl.Squeezed(), tq, C),
                                   lambda b, qi, ki: (b, qi, 0)),
            scratch_shapes=[
                pltpu.VMEM((num_heads, tq, 1), jnp.float32),   # m (running max)
                pltpu.VMEM((num_heads, tq, 1), jnp.float32),   # l (running denom)
                pltpu.VMEM((num_heads, tq, D), jnp.float32),   # acc
            ],
        ),
        compiler_params=pltpu.CompilerParams(
            dimension_semantics=("parallel", "parallel", "arbitrary"),
            vmem_limit_bytes=vmem_limit),
        cost_estimate=attn_cost,
    )(x, q, k, v, wproj_bf, bproj2)

    return out


# -----------------------------------------------------------------------------
# Pure-JAX reference mirroring the PyTorch module (f32 throughout).
# -----------------------------------------------------------------------------
def self_attn_skip_ref(x, ln_gamma, ln_beta, w_qkv, b_qkv, w_proj, b_proj, *,
                       num_heads, eps=1e-6):
    B, L, C = x.shape
    D = C // num_heads
    mean = jnp.mean(x, axis=-1, keepdims=True)
    var = jnp.mean((x - mean) ** 2, axis=-1, keepdims=True)
    xn = (x - mean) / jnp.sqrt(var + eps) * ln_gamma.reshape(1, 1, C) + ln_beta.reshape(1, 1, C)
    qkv = xn @ w_qkv + b_qkv.reshape(1, 1, 3 * C)
    qh, kh, vh = jnp.split(qkv, 3, axis=-1)

    def to_heads(t):
        return jnp.transpose(t.reshape(B, L, num_heads, D), (0, 2, 1, 3))

    qh, kh, vh = to_heads(qh), to_heads(kh), to_heads(vh)
    attn = (qh @ jnp.swapaxes(kh, -2, -1)) * (float(D) ** -0.5)
    attn = jax.nn.softmax(attn, axis=-1)
    ctx = jnp.transpose(attn @ vh, (0, 2, 1, 3)).reshape(B, L, C)
    return x + (ctx @ w_proj + b_proj.reshape(1, 1, C))


if __name__ == "__main__":
    # Small shapes implied by the module: tokens (B, L, embed_dim), num_heads=2 default.
    B, L, C = 2, 16, 32
    num_heads = 2

    key = jax.random.PRNGKey(0)
    ks = jax.random.split(key, 7)
    x = jax.random.normal(ks[0], (B, L, C), dtype=jnp.float32)
    ln_gamma = 1.0 + 0.1 * jax.random.normal(ks[1], (C,), dtype=jnp.float32)
    ln_beta = 0.1 * jax.random.normal(ks[2], (C,), dtype=jnp.float32)
    w_qkv = 0.05 * jax.random.normal(ks[3], (C, 3 * C), dtype=jnp.float32)
    b_qkv = 0.05 * jax.random.normal(ks[4], (3 * C,), dtype=jnp.float32)
    w_proj = 0.05 * jax.random.normal(ks[5], (C, C), dtype=jnp.float32)
    b_proj = 0.05 * jax.random.normal(ks[6], (C,), dtype=jnp.float32)

    # Small tiles here so the (B, q-tile, kv-tile) grid + online softmax actually iterate.
    out = self_attn_skip_layer(x, ln_gamma, ln_beta, w_qkv, b_qkv, w_proj, b_proj,
                               num_heads=num_heads, q_tile=8, kv_tile=8)
    out = jax.block_until_ready(out)

    ref = self_attn_skip_ref(x, ln_gamma, ln_beta, w_qkv, b_qkv, w_proj, b_proj,
                             num_heads=num_heads)
    assert out.shape == (B, L, C)
    assert jnp.allclose(out, ref, atol=2e-2, rtol=2e-2), \
        f"mismatch vs JAX reference, max abs err = {jnp.max(jnp.abs(out - ref))}"

    print("KERNEL_OK")
</pallas_src>

<mosaic_0001>
module attributes {stable_mosaic.version = 11 : i64} {
  func.func @_ln_qkv_kernel(%arg0: i32, %arg1: i32, %arg2: i32, %arg3: memref<1x8x32xf32, #tpu.memory_space<vmem>>, %arg4: memref<1x32xf32, #tpu.memory_space<vmem>>, %arg5: memref<1x32xf32, #tpu.memory_space<vmem>>, %arg6: memref<1x32x96xbf16, #tpu.memory_space<vmem>>, %arg7: memref<1x1x96xf32, #tpu.memory_space<vmem>>, %arg8: memref<1x2x8x16xbf16, #tpu.memory_space<vmem>>, %arg9: memref<1x2x8x16xbf16, #tpu.memory_space<vmem>>, %arg10: memref<1x2x8x16xbf16, #tpu.memory_space<vmem>>) attributes {dimension_semantics = [#tpu.dimension_semantics<parallel>, #tpu.dimension_semantics<parallel>, #tpu.dimension_semantics<arbitrary>], iteration_bounds = array<i64: 2, 2, 1>, scalar_prefetch = 0 : i64, scratch_operands = 0 : i64, tpu.core_type = #tpu.core_type<tc>, window_params = [{transform_indices = @transform_0, window_bounds = array<i64: 1, 8, 32>}, {pipeline_mode = #tpu.pipeline_mode<synchronous>, transform_indices = @transform_1, window_bounds = array<i64: 1, 32>}, {pipeline_mode = #tpu.pipeline_mode<synchronous>, transform_indices = @transform_2, window_bounds = array<i64: 1, 32>}, {pipeline_mode = #tpu.pipeline_mode<synchronous>, transform_indices = @transform_3, window_bounds = array<i64: 1, 32, 96>}, {pipeline_mode = #tpu.pipeline_mode<synchronous>, transform_indices = @transform_4, window_bounds = array<i64: 1, 1, 96>}, {transform_indices = @transform_5, window_bounds = array<i64: 1, 2, 8, 16>}, {transform_indices = @transform_6, window_bounds = array<i64: 1, 2, 8, 16>}, {transform_indices = @transform_7, window_bounds = array<i64: 1, 2, 8, 16>}]} {
    %c0 = arith.constant 0 : index
    %c0_0 = arith.constant 0 : index
    %c0_1 = arith.constant 0 : index
    %0 = vector.load %arg3[%c0, %c0_0, %c0_1] : memref<1x8x32xf32, #tpu.memory_space<vmem>>, vector<1x8x32xf32>
    %1 = vector.shape_cast %0 : vector<1x8x32xf32> to vector<8x32xf32>
    %cst = arith.constant dense<0.000000e+00> : vector<8xf32>
    %2 = vector.multi_reduction <add>, %1, %cst [1] : vector<8x32xf32> to vector<8xf32>
    %3 = vector.shape_cast %2 : vector<8xf32> to vector<8x1xf32>
    %cst_2 = arith.constant 3.200000e+01 : f32
    %4 = vector.broadcast %cst_2 : f32 to vector<8x1xf32>
    %5 = arith.divf %3, %4 : vector<8x1xf32>
    %6 = arith.mulf %1, %1 : vector<8x32xf32>
    %cst_3 = arith.constant dense<0.000000e+00> : vector<8xf32>
    %7 = vector.multi_reduction <add>, %6, %cst_3 [1] : vector<8x32xf32> to vector<8xf32>
    %8 = vector.shape_cast %7 : vector<8xf32> to vector<8x1xf32>
    %cst_4 = arith.constant 3.200000e+01 : f32
    %9 = vector.broadcast %cst_4 : f32 to vector<8x1xf32>
    %10 = arith.divf %8, %9 : vector<8x1xf32>
    %11 = arith.mulf %5, %5 : vector<8x1xf32>
    %12 = arith.subf %10, %11 : vector<8x1xf32>
    %cst_5 = arith.constant 0.000000e+00 : f32
    %13 = vector.broadcast %cst_5 : f32 to vector<8x1xf32>
    %14 = arith.maximumf %12, %13 : vector<8x1xf32>
    %15 = vector.broadcast %5 : vector<8x1xf32> to vector<8x32xf32>
    %16 = arith.subf %1, %15 : vector<8x32xf32>
    %cst_6 = arith.constant 9.99999997E-7 : f32
    %17 = vector.broadcast %cst_6 : f32 to vector<8x1xf32>
    %18 = arith.addf %14, %17 : vector<8x1xf32>
    %19 = math.rsqrt %18 : vector<8x1xf32>
    %20 = vector.broadcast %19 : vector<8x1xf32> to vector<8x32xf32>
    %21 = arith.mulf %16, %20 : vector<8x32xf32>
    %c0_7 = arith.constant 0 : index
    %c0_8 = arith.constant 0 : index
    %22 = vector.load %arg4[%c0_7, %c0_8] : memref<1x32xf32, #tpu.memory_space<vmem>>, vector<1x32xf32>
    %23 = vector.broadcast %22 : vector<1x32xf32> to vector<8x32xf32>
    %24 = arith.mulf %21, %23 : vector<8x32xf32>
    %c0_9 = arith.constant 0 : index
    %c0_10 = arith.constant 0 : index
    %25 = vector.load %arg5[%c0_9, %c0_10] : memref<1x32xf32, #tpu.memory_space<vmem>>, vector<1x32xf32>
    %26 = vector.broadcast %25 : vector<1x32xf32> to vector<8x32xf32>
    %27 = arith.addf %24, %26 : vector<8x32xf32>
    %28 = arith.truncf %27 : vector<8x32xf32> to vector<8x32xbf16>
    %c0_11 = arith.constant 0 : index
    %c0_12 = arith.constant 0 : index
    %c0_13 = arith.constant 0 : index
    %29 = vector.load %arg6[%c0_11, %c0_12, %c0_13] : memref<1x32x96xbf16, #tpu.memory_space<vmem>>, vector<1x32x96xbf16>
    %30 = vector.shape_cast %29 : vector<1x32x96xbf16> to vector<32x96xbf16>
    %cst_14 = arith.constant dense<0.000000e+00> : vector<8x96xf32>
    %31 = tpu.matmul %28, %30, %cst_14 {dimension_numbers = #tpu.dot_dimension_numbers<[1], [0], [0], [1], [0, 0, 1, 1], [], []>} : vector<8x32xbf16>, vector<32x96xbf16>, vector<8x96xf32> -> vector<8x96xf32>
    %c0_15 = arith.constant 0 : index
    %c0_16 = arith.constant 0 : index
    %c0_17 = arith.constant 0 : index
    %32 = vector.load %arg7[%c0_15, %c0_16, %c0_17] : memref<1x1x96xf32, #tpu.memory_space<vmem>>, vector<1x1x96xf32>
    %33 = vector.shape_cast %32 : vector<1x1x96xf32> to vector<1x96xf32>
    %34 = vector.broadcast %33 : vector<1x96xf32> to vector<8x96xf32>
    %35 = arith.addf %31, %34 : vector<8x96xf32>
    %36 = vector.extract_strided_slice %35 {offsets = [0, 0], sizes = [8, 16], strides = [1, 1]} : vector<8x96xf32> to vector<8x16xf32>
    %37 = arith.truncf %36 : vector<8x16xf32> to vector<8x16xbf16>
    %c0_18 = arith.constant 0 : index
    %c0_19 = arith.constant 0 : index
    %c0_20 = arith.constant 0 : index
    %c0_21 = arith.constant 0 : index
    %38 = vector.load %arg8[%c0_18, %c0_19, %c0_20, %c0_21] : memref<1x2x8x16xbf16, #tpu.memory_space<vmem>>, vector<1x1x8x16xbf16>
    %39 = vector.shape_cast %38 : vector<1x1x8x16xbf16> to vector<8x16xbf16>
    %40 = vector.shape_cast %37 : vector<8x16xbf16> to vector<1x1x8x16xbf16>
    tpu.vector_store %arg8[%c0_18, %c0_19, %c0_20, %c0_21], %40 {strides = array<i32>} : memref<1x2x8x16xbf16, #tpu.memory_space<vmem>>, vector<1x1x8x16xbf16>,
    %41 = vector.extract_strided_slice %35 {offsets = [0, 32], sizes = [8, 16], strides = [1, 1]} : vector<8x96xf32> to vector<8x16xf32>
    %42 = arith.truncf %41 : vector<8x16xf32> to vector<8x16xbf16>
    %c0_22 = arith.constant 0 : index
    %c0_23 = arith.constant 0 : index
    %c0_24 = arith.constant 0 : index
    %c0_25 = arith.constant 0 : index
    %43 = vector.load %arg9[%c0_22, %c0_23, %c0_24, %c0_25] : memref<1x2x8x16xbf16, #tpu.memory_space<vmem>>, vector<1x1x8x16xbf16>
    %44 = vector.shape_cast %43 : vector<1x1x8x16xbf16> to vector<8x16xbf16>
    %45 = vector.shape_cast %42 : vector<8x16xbf16> to vector<1x1x8x16xbf16>
    tpu.vector_store %arg9[%c0_22, %c0_23, %c0_24, %c0_25], %45 {strides = array<i32>} : memref<1x2x8x16xbf16, #tpu.memory_space<vmem>>, vector<1x1x8x16xbf16>,
    %46 = vector.extract_strided_slice %35 {offsets = [0, 64], sizes = [8, 16], strides = [1, 1]} : vector<8x96xf32> to vector<8x16xf32>
    %47 = arith.truncf %46 : vector<8x16xf32> to vector<8x16xbf16>
    %c0_26 = arith.constant 0 : index
    %c0_27 = arith.constant 0 : index
    %c0_28 = arith.constant 0 : index
    %c0_29 = arith.constant 0 : index
    %48 = vector.load %arg10[%c0_26, %c0_27, %c0_28, %c0_29] : memref<1x2x8x16xbf16, #tpu.memory_space<vmem>>, vector<1x1x8x16xbf16>
    %49 = vector.shape_cast %48 : vector<1x1x8x16xbf16> to vector<8x16xbf16>
    %50 = vector.shape_cast %47 : vector<8x16xbf16> to vector<1x1x8x16xbf16>
    tpu.vector_store %arg10[%c0_26, %c0_27, %c0_28, %c0_29], %50 {strides = array<i32>} : memref<1x2x8x16xbf16, #tpu.memory_space<vmem>>, vector<1x1x8x16xbf16>,
    %51 = vector.extract_strided_slice %35 {offsets = [0, 16], sizes = [8, 16], strides = [1, 1]} : vector<8x96xf32> to vector<8x16xf32>
    %52 = arith.truncf %51 : vector<8x16xf32> to vector<8x16xbf16>
    %c0_30 = arith.constant 0 : index
    %c1 = arith.constant 1 : index
    %c0_31 = arith.constant 0 : index
    %c0_32 = arith.constant 0 : index
    %53 = vector.load %arg8[%c0_30, %c1, %c0_31, %c0_32] : memref<1x2x8x16xbf16, #tpu.memory_space<vmem>>, vector<1x1x8x16xbf16>
    %54 = vector.shape_cast %53 : vector<1x1x8x16xbf16> to vector<8x16xbf16>
    %55 = vector.shape_cast %52 : vector<8x16xbf16> to vector<1x1x8x16xbf16>
    tpu.vector_store %arg8[%c0_30, %c1, %c0_31, %c0_32], %55 {strides = array<i32>} : memref<1x2x8x16xbf16, #tpu.memory_space<vmem>>, vector<1x1x8x16xbf16>,
    %56 = vector.extract_strided_slice %35 {offsets = [0, 48], sizes = [8, 16], strides = [1, 1]} : vector<8x96xf32> to vector<8x16xf32>
    %57 = arith.truncf %56 : vector<8x16xf32> to vector<8x16xbf16>
    %c0_33 = arith.constant 0 : index
    %c1_34 = arith.constant 1 : index
    %c0_35 = arith.constant 0 : index
    %c0_36 = arith.constant 0 : index
    %58 = vector.load %arg9[%c0_33, %c1_34, %c0_35, %c0_36] : memref<1x2x8x16xbf16, #tpu.memory_space<vmem>>, vector<1x1x8x16xbf16>
    %59 = vector.shape_cast %58 : vector<1x1x8x16xbf16> to vector<8x16xbf16>
    %60 = vector.shape_cast %57 : vector<8x16xbf16> to vector<1x1x8x16xbf16>
    tpu.vector_store %arg9[%c0_33, %c1_34, %c0_35, %c0_36], %60 {strides = array<i32>} : memref<1x2x8x16xbf16, #tpu.memory_space<vmem>>, vector<1x1x8x16xbf16>,
    %61 = vector.extract_strided_slice %35 {offsets = [0, 80], sizes = [8, 16], strides = [1, 1]} : vector<8x96xf32> to vector<8x16xf32>
    %62 = arith.truncf %61 : vector<8x16xf32> to vector<8x16xbf16>
    %c0_37 = arith.constant 0 : index
    %c1_38 = arith.constant 1 : index
    %c0_39 = arith.constant 0 : index
    %c0_40 = arith.constant 0 : index
    %63 = vector.load %arg10[%c0_37, %c1_38, %c0_39, %c0_40] : memref<1x2x8x16xbf16, #tpu.memory_space<vmem>>, vector<1x1x8x16xbf16>
    %64 = vector.shape_cast %63 : vector<1x1x8x16xbf16> to vector<8x16xbf16>
    %65 = vector.shape_cast %62 : vector<8x16xbf16> to vector<1x1x8x16xbf16>
    tpu.vector_store %arg10[%c0_37, %c1_38, %c0_39, %c0_40], %65 {strides = array<i32>} : memref<1x2x8x16xbf16, #tpu.memory_space<vmem>>, vector<1x1x8x16xbf16>,
    return
  }
  func.func @transform_0(%arg0: i32, %arg1: i32, %arg2: i32) -> (i32, i32, i32) {
    %c0_i32 = arith.constant 0 : i32
    %c0_i32_0 = arith.constant 0 : i32
    return %arg0, %arg1, %c0_i32 : i32, i32, i32
  }
  func.func @transform_1(%arg0: i32, %arg1: i32, %arg2: i32) -> (i32, i32) {
    %c0_i32 = arith.constant 0 : i32
    %c0_i32_0 = arith.constant 0 : i32
    %c0_i32_1 = arith.constant 0 : i32
    return %c0_i32, %c0_i32_0 : i32, i32
  }
  func.func @transform_2(%arg0: i32, %arg1: i32, %arg2: i32) -> (i32, i32) {
    %c0_i32 = arith.constant 0 : i32
    %c0_i32_0 = arith.constant 0 : i32
    %c0_i32_1 = arith.constant 0 : i32
    return %c0_i32, %c0_i32_0 : i32, i32
  }
  func.func @transform_3(%arg0: i32, %arg1: i32, %arg2: i32) -> (i32, i32, i32) {
    %c0_i32 = arith.constant 0 : i32
    %c0_i32_0 = arith.constant 0 : i32
    %c0_i32_1 = arith.constant 0 : i32
    return %arg2, %c0_i32, %c0_i32_0 : i32, i32, i32
  }
  func.func @transform_4(%arg0: i32, %arg1: i32, %arg2: i32) -> (i32, i32, i32) {
    %c0_i32 = arith.constant 0 : i32
    %c0_i32_0 = arith.constant 0 : i32
    %c0_i32_1 = arith.constant 0 : i32
    return %arg2, %c0_i32, %c0_i32_0 : i32, i32, i32
  }
  func.func @transform_5(%arg0: i32, %arg1: i32, %arg2: i32) -> (i32, i32, i32, i32) {
    %c0_i32 = arith.constant 0 : i32
    %c0_i32_0 = arith.constant 0 : i32
    return %arg0, %arg2, %arg1, %c0_i32 : i32, i32, i32, i32
  }
  func.func @transform_6(%arg0: i32, %arg1: i32, %arg2: i32) -> (i32, i32, i32, i32) {
    %c0_i32 = arith.constant 0 : i32
    %c0_i32_0 = arith.constant 0 : i32
    return %arg0, %arg2, %arg1, %c0_i32 : i32, i32, i32, i32
  }
  func.func @transform_7(%arg0: i32, %arg1: i32, %arg2: i32) -> (i32, i32, i32, i32) {
    %c0_i32 = arith.constant 0 : i32
    %c0_i32_0 = arith.constant 0 : i32
    return %arg0, %arg2, %arg1, %c0_i32 : i32, i32, i32, i32
  }
}

</mosaic_0001>

<bundles_post_ra>
// kernel: tpu_custom_call.1
= control target key start
LH: loop header
LB: loop body
LE: loop exit
PB: predicated region body
PF: predicated region fallthrough
CT: control target
= control target key end

     0   :  { %s1515_s0 = inlined_call_operand.hbm [shape: f32[2,16,32], index: 0, kind: input, shape index: {}]   ;;  %s1516_s1 = inlined_call_operand.hbm [shape: f32[1,32], index: 1, kind: input, shape index: {}]   ;;  %s1517_s2 = inlined_call_operand.vmem [shape: f32[1,32], index: 2, kind: input, shape index: {}]   ;;  %s1518_s3 = inlined_call_operand.hbm [shape: bf16[1,32,96], index: 3, kind: input, shape index: {}]   ;;  %s1519_s4 = inlined_call_operand.vmem [shape: f32[1,1,96], index: 4, kind: input, shape index: {}]   ;;  %s1520_s5 = inlined_call_operand.hbm [shape: bf16[2,2,16,16], index: 5, kind: output, shape index: {0}]   ;;  %s1521_s6 = inlined_call_operand.hbm [shape: bf16[2,2,16,16], index: 6, kind: output, shape index: {1}]   ;;  %s1522_s7 = inlined_call_operand.hbm [shape: bf16[2,2,16,16], index: 7, kind: output, shape index: {2}]  }
   0x1   :  { %1533 = sst [smem:[#allocation21_spill]] %s1515_s0 }
   0x2   :  { %1534 = sst [smem:[#allocation22_spill]] %s1516_s1 }
   0x3   :  { %1535 = sst [smem:[#allocation23_spill]] %s1517_s2 }
   0x4   :  { %1536 = sst [smem:[#allocation24_spill]] %s1518_s3 }
   0x5   :  { %1537 = sst [smem:[#allocation25_spill]] %s1519_s4 }
   0x6   :  { %1538 = sst [smem:[#allocation26_spill]] %s1520_s5 }
   0x7   :  { %1539 = sst [smem:[#allocation27_spill]] %s1521_s6 }
   0x8   :  { %1540 = sst [smem:[#allocation28_spill]] %s1522_s7 }
   0x9   :  { %13 = vsyncpa [#allocation3], 0 }
   0xa   :  { %15 = vsyncpa [#allocation3 + $0x1], 0 }
   0xb   :  { %16 = vsyncpa [#allocation6], 0 }
   0xc   :  { %17 = vsyncpa [#allocation4], 0 }
   0xd   :  { %19 = vsyncpa [#allocation4 + $0x1], 0 }
   0xe   :  { %20 = vsyncpa [#allocation10], 0 }
   0xf   :  { %22 = vsyncpa [#allocation10 + $0x1], 0  ;;  %s1257_s24 = smov 0   ;;  %s1259_s25 = smov 0  }
  0x10   :  { %s1261_s26 = smov 0   ;;  %s1263_s27 = smov 0  }
  0x11   :  { %s1265_s28 = smov 0   ;;  %s1267_s29 = smov 0  }
  0x12   :  { %s1269_s30 = smov 0   ;;  %s1271_s8 = smov 0  }
  0x13 LB: > { %1541 = sst [smem:[#allocation16_spill]] %s1175_s24  ;;  %s1298_s9 = sadd.s32 4294967295, %s1203_s8   ;;  %s1203_s8 = sphi %s1271_s8, %s28_s8   ;;  %s1199_s30 = sphi %s1269_s30, %s1573_s30   ;;  %s1195_s29 = sphi %s1267_s29, %s1572_s29   ;;  %s1191_s28 = sphi %s1265_s28, %s1571_s28   ;;  %s1187_s27 = sphi %s1263_s27, %s1570_s27   ;;  %s1183_s26 = sphi %s1261_s26, %s1569_s26   ;;  %s1179_s25 = sphi %s1259_s25, %s1568_s25   ;;  %s1175_s24 = sphi %s1257_s24, %s1567_s24  }
  0x14   : > { %s1523_s10 = sadd.s32 4294967294, %s1203_s8   ;;  %p69_p0 = scmp.ne.s32.totalorder %s1179_s25, %s1175_s24 }
  0x15   : > { %p70_p1 = scmp.eq.s32.totalorder %s1298_s9, 0  ;;  %p191_p2 = scmp.eq.s32.totalorder %s1298_s9, 3 }
  0x16   : > { %p197_p3 = scmp.eq.s32.totalorder %s1523_s10, 3  ;;  %p785_p5 = scmp.ge.s32.totalorder %s1203_s8, 1 }
  0x17   : > { %p1309_p4 = por %p70_p1, %p69_p0  ;;  %p264_p7 = scmp.lt.s32.totalorder %s1203_s8, 5 }
  0x18   : > { %p1314_p6 = por %p197_p3, %p69_p0  ;;  %s1545_s1 = sld [smem:[#allocation22_spill]] }
  0x19   : > { %p1322_p8 = pnand %p785_p5, %p264_p7  ;;  %s1205_s17 = smov [#allocation5]  }
  0x1a   : > { %s1543_s12 = scalar_select %p1314_p6, 1, 0 }
  0x1b   : > { %p841_p9 = pneg %p1322_p8  ;;  %s278_s18 = sshll.u32 %s1205_s17, 4  ;;  %s279_s18 = int_to_ptr.vmem [resolvable:$true] %s278_s18 }
  0x1c   : > { %1544 = sst [smem:[#allocation17_spill]] %s1543_s12  ;;  %s1206_s22 = smov [#allocation7]  }
  0x1d   : > { %s1547_s3 = sld [smem:[#allocation24_spill]]  ;;  %p842_p10 = pnand %p841_p9, %p70_p1 }
  0x1e   : > { %s276_s15 = sshll.u32 %s1545_s1, 4  ;;  %s295_s23 = sshll.u32 %s1206_s22, 4  ;;  %s277_s15 = int_to_ptr.hbm [resolvable:$true] %s276_s15  ;;  %s296_s23 = int_to_ptr.vmem [resolvable:$true] %s295_s23 }
  0x1f   : > { %844 = dma.hbm_to_vmem [thread:$0]  (!%p842_p10), %s277_s15, 16, %s279_s18, [#allocation6]  }
  0x20   : > { %s1207_s13 = smov 64   ;;  %s1208_s14 = smov 4  }
  0x21   : > { %s43_s17 = sadd.s32 1, %s1195_s29  ;;  %s47_s19 = sadd.s32 1, %s1199_s30 }
  0x22   : > { %p45_p11 = scmp.ge.s32.totalorder %s43_s17, 2  ;;  %s56_s20 = sadd.s32 1, %s1183_s26 }
  0x23   : > { %s293_s21 = sshll.u32 %s1547_s3, 4  ;;  %p63_p12 = scmp.ne.s32.totalorder %s1183_s26, %s1179_s25  ;;  %s294_s21 = int_to_ptr.hbm [resolvable:$true] %s293_s21 }
  0x24   : > { %847 = dma.hbm_to_vmem [thread:$0]  (!%p842_p10), %s294_s21, 256, %s296_s23, [#allocation6], %s1207_s13, %s1207_s13, %s1208_s14  }
  0x25   : > { %p64_p13 = scmp.eq.s32.totalorder %s1203_s8, 0  ;;  %s1575_s17 = smov (%p45_p11, %s43_s17), 0 }
  0x26   : > { %1548 = sst [smem:[#allocation18_spill]] %s1575_s17  ;;  %s1577_s19 = smov (!%p45_p11, %s47_s19), %s1199_s30 }
  0x27   : > { %s52_s15 = ssub.s32 %s1195_s29, %s1575_s17  ;;  %p1344_p0 = por %p64_p13, %p63_p12 }
  0x28   : > { %p49_p3 = scmp.ge.s32.totalorder %s1577_s19, 2  ;;  %p1350_p5 = por %p191_p2, %p63_p12 }
  0x29   : > { %p864_p7 = scmp.lt.s32.totalorder %s1203_s8, 4  ;;  %s315_s22 = sand.u32 1, %s1183_s26  }
  0x2a   : > { %s1550_s21 = scalar_select %p1350_p5, 1, 0 }
  0x2b   : > { %s1579_s19 = smov (%p49_p3, %s1577_s19), 0  ;;  %s790_s23 = sshll.u32 %s315_s22, 3 }
  0x2c   : > { %1551 = sst [smem:[#allocation19_spill]] %s1550_s21  ;;  %s51_s13 = ssub.s32 %s1199_s30, %s1579_s19 }
  0x2d   : > { %1552 = sst [smem:[#allocation20_spill]] %s1579_s19  ;;  %s53_s14 = sor.u32 %s52_s15, %s51_s13 }
  0x2e   : > { %s791_s10 = sshll.u32 %s1199_s30, 1  ;;  %p54_p9 = scmp.eq.s32.totalorder %s53_s14, 0 }
  0x2f   : > { %s323_s1 = sadd.s32 %s1195_s29, %s791_s10  ;;  %s319_s17 = scalar_lea.vmem [#allocation2], %s790_s23 }
  0x30   : > { %s792_s3 = sshll.u32 %s323_s1, 3  ;;  %s329_s12 = sshll.u32 %s319_s17, 4  ;;  %s330_s12 = int_to_ptr.vmem [resolvable:$true] %s329_s12 }
  0x31   : > { %s1363_s24 = scalar_select %p54_p9, %s1183_s26, %s56_s20  }
  0x32   : > { %s1553_s0 = sld [smem:[#allocation21_spill]]  ;;  %p849_p2 = pnand %p864_p7, %p1344_p0 }
  0x33   : > { %s316_s19 = scalar_lea.sflag [#allocation3], %s315_s22  ;;  %s1375_s1 = sand.u32 (!%p1322_p8), 1, %s1179_s25  }
  0x34   : > { %s1378_s10 = sshll.u32 (!%p1322_p8), %s1375_s1, 3 }
  0x36   : > { %338 = sbr.rel (%p1322_p8) target bundleno = 491 (0x1eb), region = 40 }
  0x38   : > { %s325_s5 = scalar_lea.hbm %s1553_s0, %s792_s3  ;;  %s341_s3 = scalar_lea.sflag (!%p1322_p8), [#allocation3], %s1375_s1 }
  0x39   : > { %s327_s21 = sshll.u32 %s325_s5, 4  ;;  %s344_s5 = scalar_lea.vmem (!%p1322_p8), [#allocation2], %s1378_s10  ;;  %s328_s21 = int_to_ptr.hbm [resolvable:$true] %s327_s21 }
  0x3a   : > { %851 = dma.hbm_to_vmem [thread:$0]  (!%p849_p2), %s328_s21, 128, %s330_s12, %s316_s19  }
  0x3b   : > { %1158 = dma.done.wait (%p1309_p4), %s341_s3, 128  }
  0x3c   : > { %1160 = vsyncadd (%p1309_p4), %s341_s3, 4294967168 }
  0x3d   : > { %1162 = dma.done.wait (%p70_p1), [#allocation6], 272  }
  0x3e   : > { %1164 = vsyncadd (%p70_p1), [#allocation6], 4294967024  ;;  %vm407_vm0 = vcmask 261120   ;;  %v406_v0 = vld [vmem:[%s344_s5] sm:$0xff]  ;;  %v1209_v4 = vmov 32.0   ;;  %v823_v13 = vld [vmem:[#allocation7] sm:$0xff] }
  0x3f   : > { %v408_v1 = vsel %vm407_vm0, %v406_v0, 0.0  ;;  %v419_v2 = vmul.f32 %v406_v0, %v406_v0  ;;  %947 = vrcp.f32 %v1209_v4  ;;  %v824_v11 = vld [vmem:[#allocation7 + $0x8] sm:$0xff]  ;;  %v944_v28 = vld [vmem:[#allocation5] ss:$0 sm:$0xff]  ;;  %s1554_s2 = sld [smem:[#allocation23_spill]]  ;;  %vm488_vm5 = vcmask 125952  }
  0x40   : > { %409 = vadd.xlane.f32.xlu0 %v408_v1  ;;  %480 = vmatpush.bf16.msra.mxu0 %v824_v11  ;;  %s1555_s4 = sld [smem:[#allocation25_spill]]  ;;  %s1210_s16 = smov 48  }
  0x41   : > { %v420_v3 = vsel %vm407_vm0, %v419_v2, 0.0  ;;  %s1211_s17 = smov 64   ;;  %s384_s19 = scalar_lea.vmem [#allocation8], %s1378_s10 }
  0x42   : > { %s1212_s20 = smov 96   ;;  %s1213_s15 = smov 112  }
  0x43   : > { %s1214_s18 = smov 80   ;;  %s815_s21 = sshll.u32 %s1191_s28, 2 }
  0x44   : > { %481 = vmatpush.bf16.msra.mxu0 %v823_v13  ;;  %s538_s22 = sadd.s32 %s1187_s27, %s815_s21  ;;  %s1407_s14 = scalar_lea.vmem [#allocation11], %s1378_s10 }
  0x45   : > { %v948_v5 = vpop.eup %947  ;;  %v945_v31 = vld [vmem:[%s1554_s2] ss:$0 sm:$0xff]  ;;  %s1404_s23 = sshll.u32 %s538_s22, 2  ;;  %s1557_s6 = sld [smem:[#allocation26_spill]] }
  0x46   : > { %v412_v6 = vmul.f32 32.0, %v948_v5  ;;  %vm416_vm1 = vweird.f32 %v948_v5  ;;  %v946_v35 = vld [vmem:[%s1555_s4] ss:$0 sm:$0xff]  ;;  %s541_s11 = sshll.u32 %s384_s19, 4  ;;  %s515_s27 = scalar_lea.sflag [#allocation4], %s1375_s1  ;;  %s542_s11 = int_to_ptr.vmem [resolvable:$true] %s541_s11 }
  0x48   : > { %421 = vadd.xlane.f32.xlu0 %v420_v3  ;;  %v413_v7 = vsub.f32 1.0, %v412_v6 }
  0x4a   : > { %v414_v8 = vmul.f32 %v948_v5, %v413_v7 }
  0x4b   : > { %s540_s7 = scalar_lea.hbm %s1557_s6, %s1404_s23 }
  0x4c   : > { %v415_v9 = vadd.f32 %v948_v5, %v414_v8  ;;  %s543_s12 = sshll.u32 %s540_s7, 4  ;;  %s544_s12 = int_to_ptr.hbm [resolvable:$true] %s543_s12 }
  0x4d   : > { %s1055_s28 = sshra.s32 %s544_s12, 4  ;;  %s1056_s28 = int_to_ptr.hbm [resolvable:$true] %s1055_s28 }
  0x4e   : > { %v417_v12 = vsel %vm416_vm1, %v948_v5, %v415_v9  ;;  %p1062_p10 = scmp.lt.s32.totalorder %s1056_s28, %s1557_s6 }
  0xb3   : > { %v410_v10 = vpop.xlane.xlu0 %409 }
  0xb4   : > { %v418_v14 = vmul.f32 %v417_v12, %v410_v10 }
  0xb6   : > { %v424_v16 = vmul.f32 %v418_v14, %v418_v14  ;;  %v427_v27 = vsub.f32 %v406_v0, %v418_v14 }
  0xbb   : > { %v422_v15 = vpop.xlane.xlu0 %421 }
  0xbc   : > { %v423_v17 = vmul.f32 %v422_v15, %v417_v12 }
  0xbe   : > { %v425_v18 = vsub.f32 %v423_v17, %v424_v16 }
  0xc0   : > { %v426_v19 = vmax.f32 %v425_v18, 0.0 }
  0xc2   : > { %v428_v20 = vadd.f32 1e-06, %v426_v19 }
  0xc4   : > { %949 = vrsqrt.f32 %v428_v20  ;;  %vm435_vm3 = vweird.f32 %v428_v20 }
  0xca   : > { %v950_v21 = vpop.eup %949 }
  0xcb   : > { %v430_v22 = vmul.f32 %v950_v21, %v428_v20  ;;  %vm436_vm2 = vweird.f32 %v950_v21 }
  0xcc   : > { %vm437_vm4 = vmor %vm435_vm3, %vm436_vm2 }
  0xcd   : > { %v431_v23 = vmul.f32 %v950_v21, %v430_v22 }
  0xcf   : > { %v432_v24 = vmul.f32 0.5, %v431_v23 }
  0xd1   : > { %v433_v25 = vsub.f32 1.5, %v432_v24 }
  0xd3   : > { %v434_v26 = vmul.f32 %v950_v21, %v433_v25 }
  0xd5   : > { %v438_v29 = vsel %vm437_vm4, %v950_v21, %v434_v26 }
  0xd6   : > { %v439_v30 = vmul.f32 %v438_v29, %v427_v27 }
  0xd8   : > { %v444_v32 = vmul.f32 %v944_v28, %v439_v30 }
  0xda   : > { %v449_v33 = vadd.f32 %v945_v31, %v444_v32 }
  0xdc   : > { %v450_v34 = vpack.c.bf16 %v449_v33, %v449_v33 }
  0xde   : > { %808 = vmatmul.msk.bf16.vlgmr.msra.gmra.mxu0 %vm407_vm0, %v450_v34 }
 0x15b   : > { %v483_v36 = vpop.f32.mrf.mxu0 }
 0x15c   : > { %v484_v37 = vadd.f32 %v946_v35, %v483_v36 }
 0x15e   : > { %v487_v38 = vpack.c.bf16 %v484_v37, %v484_v37 }
 0x160   : > { %509 = vrot.lane.b32.xlu0 %v487_v38, %s1210_s16  ;;  %495 = vrot.lane.b32.xlu2 %v487_v38, %s1211_s17  ;;  %489 = vst.msk [vmem:[%s384_s19] sm:$0xf] %vm488_vm5, %v487_v38  ;;  %s1057_s16 = scalar_lea.hbm %s1056_s28, 8 }
 0x161   : > { %491 = vrot.lane.b32.xlu1 %v487_v38, %s1212_s20  ;;  %p1058_p1 = scmp.ne.s32.totalorder %s1056_s28, %s1057_s16 }
 0x163   : > { %v485_v39 = vpop.f32.mrf.mxu0  ;;  %p1059_p4 = pnand %p1058_p1, %p1350_p5 }
 0x165   : > { %p1060_p8 = pneg %p1059_p4 }
 0x168   : > { %499 = vrot.lane.b32.xlu2 %v487_v38, %s1213_s15 }
 0x169   : > { %504 = vrot.lane.b32.xlu1 %v487_v38, %s1214_s18  ;;  %s1061_s18 = scalar_lea.hbm %s1557_s6, 32 }
 0x16a   : > { %p1063_p11 = scmp.lt.s32.totalorder %s1061_s18, %s1057_s16 }
 0x16c   : > { %p1064_p12 = por %p1063_p11, %p1062_p10 }
 0x16e   : > { %p1065_p13 = pnand %p1064_p12, %p1060_p8 }
 0x1ba   : > { %v496_v40 = vpop.permute.xlu2 %495 }
 0x1bb   : > { %498 = vst.msk [vmem:[%s1407_s14] sm:$0xf] %vm488_vm5, %v496_v40 }
 0x1c2   : > { %v500_v41 = vpop.permute.xlu2 %499 }
 0x1c3   : > { %809 = vst.msk [vmem:[%s384_s19 + $0x4] sm:$0xf] %vm488_vm5, %v500_v41 }
 0x1c4   : > { %1068 = shalt.err (!%p1065_p13)
}
 0x1c5   : > { %s1215_s1 = smov 128   ;;  %s1216_s19 = smov 4  }
 0x1c6   : > { %835 = dma.vmem_to_hbm [thread:$0]  (%p1350_p5), %s542_s11, 128, %s544_s12, %s515_s27, %s1211_s17, %s1215_s1, %s1216_s19  }
 0x1c7   : > { %s391_s3 = scalar_lea.vmem [#allocation9], %s1378_s10  ;;  %s1558_s28 = sld [smem:[#allocation27_spill]] }
 0x1c8   : > { %s1560_s21 = sld [smem:[#allocation28_spill]]  ;;  %s562_s0 = sshll.u32 %s391_s3, 4  ;;  %s563_s0 = int_to_ptr.vmem [resolvable:$true] %s562_s0 }
 0x1c9   : > { %s519_s2 = sand.u32 1, %s1298_s9   ;;  %s583_s11 = sshll.u32 %s1407_s14, 4  ;;  %s1446_s11 = int_to_ptr.vmem [resolvable:$true] %s583_s11 }
 0x1ca   : > { %s1450_s10 = scalar_lea.sflag [#allocation10], %s519_s2 }
 0x1cd   : > { %s1559_s16 = smov %s1558_s28  ;;  %s561_s20 = scalar_lea.hbm %s1558_s28, %s1404_s23 }
 0x1ce   : > { %s582_s22 = scalar_lea.hbm %s1560_s21, %s1404_s23  ;;  %s564_s4 = sshll.u32 %s561_s20, 4  ;;  %s565_s4 = int_to_ptr.hbm [resolvable:$true] %s564_s4 }
 0x1cf   : > { %s1444_s12 = sshll.u32 %s582_s22, 4  ;;  %s1083_s27 = sshra.s32 %s565_s4, 4  ;;  %s586_s12 = int_to_ptr.hbm [resolvable:$true] %s1444_s12  ;;  %s1084_s27 = int_to_ptr.hbm [resolvable:$true] %s1083_s27 }
 0x1d0   : > { %s1085_s23 = scalar_lea.hbm %s1084_s27, 8  ;;  %s1089_s5 = scalar_lea.hbm %s1559_s16, 32 }
 0x1d1   : > { %p1086_p0 = scmp.ne.s32.totalorder %s1084_s27, %s1085_s23  ;;  %p1090_p9 = scmp.lt.s32.totalorder %s1084_s27, %s1559_s16 }
 0x1d2   : > { %v510_v42 = vpop.permute.xlu0 %509  ;;  %p1091_p2 = scmp.lt.s32.totalorder %s1089_s5, %s1085_s23 }
 0x1d3   : > { %811 = vst.msk [vmem:[%s1407_s14 + $0x4] sm:$0xf] %vm488_vm5, %v510_v42  ;;  %v492_v43 = vpop.permute.xlu1 %491  ;;  %p1087_p3 = pnand %p1086_p0, %p1350_p5 }
 0x1d4   : > { %494 = vst.msk [vmem:[%s391_s3] sm:$0xf] %vm488_vm5, %v492_v43  ;;  %p1092_p1 = por %p1091_p2, %p1090_p9 }
 0x1d5   : > { %p1088_p7 = pneg %p1087_p3 }
 0x1d7   : > { %p1093_p4 = pnand %p1092_p1, %p1088_p7 }
 0x1db   : > { %v505_v44 = vpop.permute.xlu1 %504 }
 0x1dc   : > { %810 = vst.msk [vmem:[%s391_s3 + $0x4] sm:$0xf] %vm488_vm5, %v505_v44 }
 0x1dd   : > { %1096 = shalt.err (!%p1093_p4)
}
 0x1de   : > { %836 = dma.vmem_to_hbm [thread:$0]  (%p1350_p5), %s563_s0, 128, %s565_s4, %s1450_s10, %s1211_s17, %s1215_s1, %s1216_s19  }
 0x1df   : > { %s1111_s2 = sshra.s32 %s586_s12, 4  ;;  %s1117_s18 = scalar_lea.hbm %s1560_s21, 32  ;;  %s1112_s2 = int_to_ptr.hbm [resolvable:$true] %s1111_s2 }
 0x1e0   : > { %s1113_s3 = scalar_lea.hbm %s1112_s2, 8  ;;  %p1118_p12 = scmp.lt.s32.totalorder %s1112_s2, %s1560_s21 }
 0x1e1   : > { %p1114_p8 = scmp.ne.s32.totalorder %s1112_s2, %s1113_s3  ;;  %p1119_p13 = scmp.lt.s32.totalorder %s1117_s18, %s1113_s3 }
 0x1e3   : > { %p1115_p10 = pnand %p1114_p8, %p1350_p5  ;;  %p1120_p0 = por %p1119_p13, %p1118_p12 }
 0x1e5   : > { %p1116_p11 = pneg %p1115_p10 }
 0x1e7   : > { %p1121_p3 = pnand %p1120_p0, %p1116_p11 }
 0x1e9   : > { %1124 = shalt.err (!%p1121_p3)
}
 0x1ea   : > { %837 = dma.vmem_to_hbm [thread:$0]  (%p1350_p5), %s1446_s11, 128, %s586_s12, %s1450_s10, %s1211_s17, %s1215_s1, %s1216_s19  }
 0x1eb PF: > { %s1561_s0 = sld [smem:[#allocation16_spill]]  ;;  %p867_p7 = scmp.ge.s32.totalorder %s1203_s8, 2 }
 0x1ed   : > { %p853_p9 = pnand %p867_p7, %p1314_p6 }
 0x1ef   : > { %p854_p2 = pneg %p853_p9 }
 0x1f1   : > { %s600_s23 = sand.u32 1, %s1561_s0  }
 0x1f2   : > { %s601_s9 = scalar_lea.sflag [#allocation4], %s600_s23 }
 0x1f3   : > { %1166 = dma.done.wait (%p854_p2), %s601_s9, 128  }
 0x1f4   : > { %1168 = vsyncadd (%p854_p2), %s601_s9, 4294967168  ;;  %s1563_s13 = sadd.s32 4294967294, %s1203_s8  }
 0x1f5   : > { %s610_s14 = sand.u32 1, %s1563_s13  }
 0x1f6   : > { %s611_s5 = scalar_lea.sflag [#allocation10], %s610_s14 }
 0x1f7   : > { %1170 = dma.done.wait (%p854_p2), %s611_s5, 256  }
 0x1f8   : > { %1172 = vsyncadd (%p854_p2), %s611_s5, 4294967040  ;;  %s28_s8 = sadd.s32 1, %s1203_s8   ;;  %s1564_s17 = smov %s1363_s24 }
 0x1f9   : > { %p25_p5 = scmp.ge.s32.totalorder %s28_s8, 6   ;;  %s1565_s1 = sld [smem:[#allocation18_spill]] }
 0x1fa   : > { %s1566_s19 = sld [smem:[#allocation20_spill]]  ;;  %s1567_s24 = smov %s1179_s25 }
 0x1fb   : > { %s1568_s25 = smov %s1183_s26  ;;  %s1569_s26 = smov %s1564_s17 }
 0x1fc   : > { %s1570_s27 = smov %s1195_s29  ;;  %s1571_s28 = smov %s1199_s30 }
 0x1fd   :  { %27 = sbr.rel (!%p25_p5) target bundleno = 19 (0x13), region = 132 }
 0x1ff   : > { %s1572_s29 = smov %s1565_s1 }
 0x200   : > { %s1573_s30 = smov %s1566_s19 }
 0x202   :  { %627 = vsyncpa [#allocation3], 1 }
 0x203   :  { %629 = vsyncpa [#allocation3 + $0x1], 1 }
 0x204   :  { %630 = vsyncpa [#allocation6], 1 }
 0x205   :  { %631 = vsyncpa [#allocation4], 1 }
 0x206   :  { %633 = vsyncpa [#allocation4 + $0x1], 1 }
 0x207   :  { %634 = vsyncpa [#allocation10], 1 }
 0x208   :  { %636 = vsyncpa [#allocation10 + $0x1], 1 }

</bundles_post_ra>
